<compile_context>
chip_gen: v7x
topology: tpu7x:2x2x1
jax: 0.10.0
libtpu: 0.0.40
codegen_flags: <defaults>
</compile_context>

<pallas_src>
import jax
import jax.numpy as jnp
from jax.experimental import pallas as pl
from jax.experimental.pallas import tpu as pltpu


# ----------------------------- Pallas kernel --------------------------------

def ae_forward_kernel(x_ref,
                      w1_ref, b1_ref,     # encoder L1:           128 -> 64
                      w23_ref, b23_ref,   # fused enc-L2/dec-L1:   64 -> 64
                      w4_ref, b4_ref,     # decoder L2:            64 -> 128
                      out_ref):
    x = x_ref[...]

    h1 = jnp.tanh(
        jnp.dot(x, w1_ref[...], preferred_element_type=jnp.float32) + b1_ref[...]
    )
    h2 = jnp.tanh(
        jnp.dot(h1, w23_ref[...], preferred_element_type=jnp.float32) + b23_ref[...]
    )
    x_hat = jnp.dot(h2, w4_ref[...], preferred_element_type=jnp.float32) + b4_ref[...]

    out_ref[...] = x_hat.astype(out_ref.dtype)


# ------------------------------- wrapper -------------------------------------

def _round_up(n, m):
    return ((n + m - 1) // m) * m


def prepare_params(params):
    """One-time parameter prep: collapse the two linear layers around the
    (activation-free) latent into a single 64x64 matmul.  Mathematically exact."""
    (w1, b1, w2, b2, w3, b3, w4, b4) = params
    w23 = (w2 @ w3).astype(jnp.float32)          # [64, 64]
    b23 = (b2 @ w3 + b3).astype(jnp.float32)     # [1, 64]
    return (w1.astype(jnp.float32), b1.astype(jnp.float32),
            w23, b23,
            w4.astype(jnp.float32), b4.astype(jnp.float32))


def _choose_tile(B, tb):
    """Batch tile: multiple of 8 sublanes, capped at `tb`.  For moderate B that
    would otherwise fit one tile, split in two so v7x can shard across its 2 TCs."""
    TB = min(tb, _round_up(B, 8))
    if B >= 16 and pl.cdiv(B, TB) < 2:
        TB = max(8, _round_up(pl.cdiv(B, 2), 8))
    return TB


def ae_forward(x, fused_params, *, tb=2048):
    """Fused auto-encoder forward pass as a single batch-tiled Pallas call.

    `fused_params` must come from prepare_params(); do NOT pass raw params here
    (keeps the fusion work out of the per-call path)."""
    (w1, b1, w23, b23, w4, b4) = fused_params

    B, N = x.shape
    TB = _choose_tile(B, tb)
    grid = (pl.cdiv(B, TB),)   # ragged last block handled by Pallas (rows independent)

    def resident_spec(arr):
        # Whole array as one VMEM-resident block, constant across grid steps.
        ndim = arr.ndim
        return pl.BlockSpec(arr.shape, lambda i, _n=ndim: (0,) * _n)

    out = pl.pallas_call(
        ae_forward_kernel,
        out_shape=jax.ShapeDtypeStruct((B, N), jnp.float32),
        grid_spec=pl.GridSpec(
            grid=grid,
            in_specs=[
                pl.BlockSpec((TB, N), lambda i: (i, 0)),   # x tile
                resident_spec(w1), resident_spec(b1),
                resident_spec(w23), resident_spec(b23),
                resident_spec(w4), resident_spec(b4),
            ],
            out_specs=pl.BlockSpec((TB, N), lambda i: (i, 0)),
        ),
        compiler_params=pltpu.CompilerParams(
            dimension_semantics=("parallel",),             # shard batch tiles on v7x
        ),
    )(x, w1, b1, w23, b23, w4, b4)

    return out


# --------------------------- parameter creation ------------------------------

def init_linear(key, fan_in, fan_out):
    """Deterministic init mimicking PyTorch nn.Linear default (U[-1/sqrt(in), 1/sqrt(in)])."""
    kw, kb = jax.random.split(key)
    bound = 1.0 / jnp.sqrt(jnp.float32(fan_in))
    w = jax.random.uniform(kw, (fan_in, fan_out), jnp.float32, -bound, bound)
    b = jax.random.uniform(kb, (1, fan_out), jnp.float32, -bound, bound)
    return w, b


def make_params(key, n_in=128, n_hidden=64, n_latent=16):
    k1, k2, k3, k4 = jax.random.split(key, 4)
    w1, b1 = init_linear(k1, n_in, n_hidden)      # encoder L1
    w2, b2 = init_linear(k2, n_hidden, n_latent)  # encoder L2
    w3, b3 = init_linear(k3, n_latent, n_hidden)  # decoder L1
    w4, b4 = init_linear(k4, n_hidden, n_in)      # decoder L2
    return (w1, b1, w2, b2, w3, b3, w4, b4)


def ae_forward_ref(x, params):
    """Plain-JAX reference of the original (unfused) four-layer forward pass."""
    (w1, b1, w2, b2, w3, b3, w4, b4) = params
    h1 = jnp.tanh(x @ w1 + b1)
    z = h1 @ w2 + b2
    h2 = jnp.tanh(z @ w3 + b3)
    return h2 @ w4 + b4


# --------------------------------- main --------------------------------------

if __name__ == "__main__":
    key = jax.random.PRNGKey(0)
    k_x, k_p = jax.random.split(key)

    N = 128  # 128-point Burgers field (lane axis)
    params = make_params(k_p)
    fused_params = prepare_params(params)   # one-time, outside the per-call path

    grid_x = jnp.linspace(0.0, 1.0, N, dtype=jnp.float32)

    ok = True
    # B=8: single-tile small batch; B=12: ragged single block;
    # B=40: multi-step grid (v7x split heuristic) with a ragged last block.
    for B, kk in ((8, 0), (12, 1), (40, 2)):
        phases = jax.random.uniform(jax.random.fold_in(k_x, kk), (B, 1),
                                    jnp.float32, 0.0, 2.0 * jnp.pi)
        x = jnp.sin(2.0 * jnp.pi * grid_x[None, :] + phases).astype(jnp.float32)

        out = jax.block_until_ready(ae_forward(x, fused_params))
        ref = ae_forward_ref(x, params)

        ok = ok and (out.shape == (B, N))
        ok = ok and bool(jnp.allclose(out, ref, atol=1e-4, rtol=1e-4))

    assert ok, "Pallas output mismatch vs reference"
    print("KERNEL_OK")
</pallas_src>

<mosaic_0001>
module attributes {stable_mosaic.version = 11 : i64} {
  func.func @ae_forward_kernel(%arg0: i32, %arg1: memref<8x128xf32, #tpu.memory_space<vmem>>, %arg2: memref<128x64xf32, #tpu.memory_space<vmem>>, %arg3: memref<1x64xf32, #tpu.memory_space<vmem>>, %arg4: memref<64x64xf32, #tpu.memory_space<vmem>>, %arg5: memref<1x64xf32, #tpu.memory_space<vmem>>, %arg6: memref<64x128xf32, #tpu.memory_space<vmem>>, %arg7: memref<1x128xf32, #tpu.memory_space<vmem>>, %arg8: memref<8x128xf32, #tpu.memory_space<vmem>>) attributes {dimension_semantics = [#tpu.dimension_semantics<parallel>], iteration_bounds = array<i64: 1>, scalar_prefetch = 0 : i64, scratch_operands = 0 : i64, tpu.core_type = #tpu.core_type<tc>, window_params = [{transform_indices = @transform_0, window_bounds = array<i64: 8, 128>}, {pipeline_mode = #tpu.pipeline_mode<synchronous>, transform_indices = @transform_1, window_bounds = array<i64: 128, 64>}, {pipeline_mode = #tpu.pipeline_mode<synchronous>, transform_indices = @transform_2, window_bounds = array<i64: 1, 64>}, {pipeline_mode = #tpu.pipeline_mode<synchronous>, transform_indices = @transform_3, window_bounds = array<i64: 64, 64>}, {pipeline_mode = #tpu.pipeline_mode<synchronous>, transform_indices = @transform_4, window_bounds = array<i64: 1, 64>}, {pipeline_mode = #tpu.pipeline_mode<synchronous>, transform_indices = @transform_5, window_bounds = array<i64: 64, 128>}, {pipeline_mode = #tpu.pipeline_mode<synchronous>, transform_indices = @transform_6, window_bounds = array<i64: 1, 128>}, {transform_indices = @transform_7, window_bounds = array<i64: 8, 128>}]} {
    %c0 = arith.constant 0 : index
    %c0_0 = arith.constant 0 : index
    %0 = vector.load %arg1[%c0, %c0_0] : memref<8x128xf32, #tpu.memory_space<vmem>>, vector<8x128xf32>
    %c0_1 = arith.constant 0 : index
    %c0_2 = arith.constant 0 : index
    %1 = vector.load %arg2[%c0_1, %c0_2] : memref<128x64xf32, #tpu.memory_space<vmem>>, vector<128x64xf32>
    %cst = arith.constant dense<0.000000e+00> : vector<8x64xf32>
    %2 = tpu.matmul %0, %1, %cst {dimension_numbers = #tpu.dot_dimension_numbers<[1], [0], [0], [1], [0, 0, 1, 1], [], []>} : vector<8x128xf32>, vector<128x64xf32>, vector<8x64xf32> -> vector<8x64xf32>
    %c0_3 = arith.constant 0 : index
    %c0_4 = arith.constant 0 : index
    %3 = vector.load %arg3[%c0_3, %c0_4] : memref<1x64xf32, #tpu.memory_space<vmem>>, vector<1x64xf32>
    %4 = vector.broadcast %3 : vector<1x64xf32> to vector<8x64xf32>
    %5 = arith.addf %2, %4 : vector<8x64xf32>
    %6 = math.tanh %5 : vector<8x64xf32>
    %c0_5 = arith.constant 0 : index
    %c0_6 = arith.constant 0 : index
    %7 = vector.load %arg4[%c0_5, %c0_6] : memref<64x64xf32, #tpu.memory_space<vmem>>, vector<64x64xf32>
    %cst_7 = arith.constant dense<0.000000e+00> : vector<8x64xf32>
    %8 = tpu.matmul %6, %7, %cst_7 {dimension_numbers = #tpu.dot_dimension_numbers<[1], [0], [0], [1], [0, 0, 1, 1], [], []>} : vector<8x64xf32>, vector<64x64xf32>, vector<8x64xf32> -> vector<8x64xf32>
    %c0_8 = arith.constant 0 : index
    %c0_9 = arith.constant 0 : index
    %9 = vector.load %arg5[%c0_8, %c0_9] : memref<1x64xf32, #tpu.memory_space<vmem>>, vector<1x64xf32>
    %10 = vector.broadcast %9 : vector<1x64xf32> to vector<8x64xf32>
    %11 = arith.addf %8, %10 : vector<8x64xf32>
    %12 = math.tanh %11 : vector<8x64xf32>
    %c0_10 = arith.constant 0 : index
    %c0_11 = arith.constant 0 : index
    %13 = vector.load %arg6[%c0_10, %c0_11] : memref<64x128xf32, #tpu.memory_space<vmem>>, vector<64x128xf32>
    %cst_12 = arith.constant dense<0.000000e+00> : vector<8x128xf32>
    %14 = tpu.matmul %12, %13, %cst_12 {dimension_numbers = #tpu.dot_dimension_numbers<[1], [0], [0], [1], [0, 0, 1, 1], [], []>} : vector<8x64xf32>, vector<64x128xf32>, vector<8x128xf32> -> vector<8x128xf32>
    %c0_13 = arith.constant 0 : index
    %c0_14 = arith.constant 0 : index
    %15 = vector.load %arg7[%c0_13, %c0_14] : memref<1x128xf32, #tpu.memory_space<vmem>>, vector<1x128xf32>
    %16 = vector.broadcast %15 : vector<1x128xf32> to vector<8x128xf32>
    %17 = arith.addf %14, %16 : vector<8x128xf32>
    %c0_15 = arith.constant 0 : index
    %c0_16 = arith.constant 0 : index
    %18 = vector.load %arg8[%c0_15, %c0_16] : memref<8x128xf32, #tpu.memory_space<vmem>>, vector<8x128xf32>
    tpu.vector_store %arg8[%c0_15, %c0_16], %17 {strides = array<i32>} : memref<8x128xf32, #tpu.memory_space<vmem>>, vector<8x128xf32>,
    return
  }
  func.func @transform_0(%arg0: i32) -> (i32, i32) {
    %c0_i32 = arith.constant 0 : i32
    %c0_i32_0 = arith.constant 0 : i32
    return %arg0, %c0_i32 : i32, i32
  }
  func.func @transform_1(%arg0: i32) -> (i32, i32) {
    %c0_i32 = arith.constant 0 : i32
    %c0_i32_0 = arith.constant 0 : i32
    %c0_i32_1 = arith.constant 0 : i32
    return %c0_i32, %c0_i32_0 : i32, i32
  }
  func.func @transform_2(%arg0: i32) -> (i32, i32) {
    %c0_i32 = arith.constant 0 : i32
    %c0_i32_0 = arith.constant 0 : i32
    %c0_i32_1 = arith.constant 0 : i32
    return %c0_i32, %c0_i32_0 : i32, i32
  }
  func.func @transform_3(%arg0: i32) -> (i32, i32) {
    %c0_i32 = arith.constant 0 : i32
    %c0_i32_0 = arith.constant 0 : i32
    %c0_i32_1 = arith.constant 0 : i32
    return %c0_i32, %c0_i32_0 : i32, i32
  }
  func.func @transform_4(%arg0: i32) -> (i32, i32) {
    %c0_i32 = arith.constant 0 : i32
    %c0_i32_0 = arith.constant 0 : i32
    %c0_i32_1 = arith.constant 0 : i32
    return %c0_i32, %c0_i32_0 : i32, i32
  }
  func.func @transform_5(%arg0: i32) -> (i32, i32) {
    %c0_i32 = arith.constant 0 : i32
    %c0_i32_0 = arith.constant 0 : i32
    %c0_i32_1 = arith.constant 0 : i32
    return %c0_i32, %c0_i32_0 : i32, i32
  }
  func.func @transform_6(%arg0: i32) -> (i32, i32) {
    %c0_i32 = arith.constant 0 : i32
    %c0_i32_0 = arith.constant 0 : i32
    %c0_i32_1 = arith.constant 0 : i32
    return %c0_i32, %c0_i32_0 : i32, i32
  }
  func.func @transform_7(%arg0: i32) -> (i32, i32) {
    %c0_i32 = arith.constant 0 : i32
    %c0_i32_0 = arith.constant 0 : i32
    return %arg0, %c0_i32 : i32, i32
  }
}

</mosaic_0001>

<bundles_post_ra>
// kernel: tpu_custom_call.1
= control target key start
LH: loop header
LB: loop body
LE: loop exit
PB: predicated region body
PF: predicated region fallthrough
CT: control target
= control target key end

     0   :  { %v508_v3 = vmov 0.0|0.0   ;;  %vm509_vm0 = vmmov 0   ;;  %v510_v6 = vmov 0.0   ;;  %s696_s0 = inlined_call_operand.vmem [shape: f32[8,128], index: 0, kind: input, shape index: {}]   ;;  %s697_s1 = inlined_call_operand.vmem [shape: f32[128,64], index: 1, kind: input, shape index: {}]   ;;  %s698_s2 = inlined_call_operand.vmem [shape: f32[1,64], index: 2, kind: input, shape index: {}]   ;;  %s699_s3 = inlined_call_operand.vmem [shape: f32[64,64], index: 3, kind: input, shape index: {}]   ;;  %s700_s4 = inlined_call_operand.vmem [shape: f32[1,64], index: 4, kind: input, shape index: {}]   ;;  %s701_s5 = inlined_call_operand.vmem [shape: f32[64,128], index: 5, kind: input, shape index: {}]   ;;  %s702_s6 = inlined_call_operand.vmem [shape: f32[1,128], index: 6, kind: input, shape index: {}]   ;;  %s703_s7 = inlined_call_operand.hbm [shape: f32[8,128], index: 7, kind: output, shape index: {}]  }
   0x1   :  { %v28_v0 = vld [vmem:[%s697_s1] sm:$0xff]  ;;  %v29_v1 = vld [vmem:[%s697_s1 + $0x8] sm:$0xff]  ;;  %v30_v2 = vld [vmem:[%s697_s1 + $0x10] sm:$0xff]  ;;  %428 = vmatprep.subr.bf16.mxu0 %v508_v3  ;;  %387 = vmatprep.mubr.msk.f32.mxu0 %vm509_vm0, %v510_v6 }
   0x2   :  { %v429_v4 = vpack.c.bf16 %v29_v1, %v28_v0  ;;  %v31_v5 = vld [vmem:[%s697_s1 + $0x18] sm:$0xff]  ;;  %452 = vmatprep.subr.bf16.mxu1 %v508_v3  ;;  %406 = vmatprep.mubr.msk.f32.mxu1 %vm509_vm0, %v510_v6  ;;  %v32_v8 = vld [vmem:[%s697_s1 + $0x20] sm:$0xff]  ;;  %v33_v9 = vld [vmem:[%s697_s1 + $0x28] sm:$0xff] }
   0x3   :  { %v432_v7 = vpack.c.bf16 %v31_v5, %v30_v2  ;;  %v122_v10 = vld [vmem:[%s699_s3] sm:$0xff]  ;;  %v123_v11 = vld [vmem:[%s699_s3 + $0x8] sm:$0xff] }
   0x4   :  { %430 = vmatpush3.bf16.msra.mxu0 %v429_v4 }
   0x5   :  { %431 = vmatprep.subr.bf16.mxu0 %v508_v3 }
   0x6   :  { %12 = vsyncpa [#allocation3], 0  ;;  %v435_v12 = vpack.c.bf16 %v33_v9, %v32_v8  ;;  %v453_v13 = vpack.c.bf16 %v123_v11, %v122_v10  ;;  %v34_v14 = vld [vmem:[%s697_s1 + $0x30] sm:$0xff]  ;;  %v35_v15 = vld [vmem:[%s697_s1 + $0x38] sm:$0xff]  ;;  %vm137_vm1 = vcmask 523264  }
   0x7   :  { %v438_v16 = vpack.c.bf16 %v35_v15, %v34_v14  ;;  %v36_v17 = vld [vmem:[%s697_s1 + $0x40] sm:$0xff]  ;;  %v37_v18 = vld [vmem:[%s697_s1 + $0x48] sm:$0xff]  ;;  %v38_v20 = vld [vmem:[%s697_s1 + $0x50] sm:$0xff] }
   0x8   :  { %433 = vmatpush3.bf16.msra.mxu0 %v432_v7  ;;  %454 = vmatpush3.bf16.msra.mxu1 %v453_v13  ;;  %v441_v19 = vpack.c.bf16 %v37_v18, %v36_v17  ;;  %v39_v21 = vld [vmem:[%s697_s1 + $0x58] sm:$0xff]  ;;  %v40_v23 = vld [vmem:[%s697_s1 + $0x60] sm:$0xff]  ;;  %v41_v24 = vld [vmem:[%s697_s1 + $0x68] sm:$0xff] }
   0x9   :  { %434 = vmatprep.subr.bf16.mxu0 %v508_v3  ;;  %455 = vmatprep.subr.bf16.mxu1 %v508_v3  ;;  %v444_v22 = vpack.c.bf16 %v39_v21, %v38_v20  ;;  %v447_v25 = vpack.c.bf16 %v41_v24, %v40_v23  ;;  %v42_v26 = vld [vmem:[%s697_s1 + $0x70] sm:$0xff]  ;;  %v43_v27 = vld [vmem:[%s697_s1 + $0x78] sm:$0xff]  ;;  %v27_v29 = vld [vmem:[%s696_s0] sm:$0xff] }
   0xa   :  { %v450_v28 = vpack.c.bf16 %v43_v27, %v42_v26  ;;  %v124_v30 = vld [vmem:[%s699_s3 + $0x10] sm:$0xff]  ;;  %v125_v31 = vld [vmem:[%s699_s3 + $0x18] sm:$0xff]  ;;  %v126_v33 = vld [vmem:[%s699_s3 + $0x20] sm:$0xff] }
   0xb   :  { %v456_v32 = vpack.c.bf16 %v125_v31, %v124_v30  ;;  %v127_v34 = vld [vmem:[%s699_s3 + $0x28] sm:$0xff]  ;;  %v128_v36 = vld [vmem:[%s699_s3 + $0x30] sm:$0xff]  ;;  %v129_v37 = vld [vmem:[%s699_s3 + $0x38] sm:$0xff] }
   0xc   :  { %436 = vmatpush3.bf16.msra.mxu0 %v435_v12  ;;  %v459_v35 = vpack.c.bf16 %v127_v34, %v126_v33  ;;  %v462_v38 = vpack.c.bf16 %v129_v37, %v128_v36  ;;  %v315_v39 = vld [vmem:[%s698_s2] ss:$0 sm:$0xff]  ;;  %v213_v44 = vld [vmem:[%s701_s5 + $0x8] sm:$0xff]  ;;  %v214_v47 = vld [vmem:[%s701_s5 + $0x10] sm:$0xff] }
   0xd   :  { %437 = vmatprep.subr.bf16.mxu0 %v508_v3  ;;  %457 = vmatpush3.bf16.msra.mxu1 %v456_v32  ;;  %v212_v43 = vld [vmem:[%s701_s5] sm:$0xff]  ;;  %v215_v48 = vld [vmem:[%s701_s5 + $0x18] sm:$0xff]  ;;  %v217_v51 = vld [vmem:[%s701_s5 + $0x28] sm:$0xff] }
   0xe   :  { %458 = vmatprep.subr.bf16.mxu1 %v508_v3  ;;  %v465_v45 = vpack.c.bf16 %v213_v44, %v212_v43  ;;  %v468_v49 = vpack.c.bf16 %v215_v48, %v214_v47  ;;  %v216_v50 = vld [vmem:[%s701_s5 + $0x20] sm:$0xff]  ;;  %v218_v53 = vld [vmem:[%s701_s5 + $0x30] sm:$0xff]  ;;  %v219_v54 = vld [vmem:[%s701_s5 + $0x38] sm:$0xff]  ;;  %s511_s5 = smov [#allocation2]  }
   0xf   :  { %v471_v52 = vpack.c.bf16 %v217_v51, %v216_v50  ;;  %v474_v55 = vpack.c.bf16 %v219_v54, %v218_v53  ;;  %v316_v56 = vld [vmem:[%s700_s4] ss:$0 sm:$0xff]  ;;  %s307_s22 = sshll.u32 %s511_s5, 4  ;;  %s308_s22 = int_to_ptr.vmem [resolvable:$true] %s307_s22 }
  0x10   :  { %439 = vmatpush3.bf16.msra.mxu0 %v438_v16  ;;  %v318_v61 = vld [vmem:[%s702_s6] ss:$0 sm:$0xff]  ;;  %s484_s0 = scalar_lea.vmem %s308_s22, 128  ;;  %p489_p1 = scmp.lt.s32.totalorder %s308_s22, %s308_s22 }
  0x11   :  { %440 = vmatprep.subr.bf16.mxu0 %v508_v3  ;;  %460 = vmatpush3.bf16.msra.mxu1 %v459_v35  ;;  %p485_p0 = scmp.ne.s32.totalorder %s308_s22, %s484_s0  ;;  %p490_p2 = scmp.lt.s32.totalorder %s484_s0, %s484_s0 }
  0x12   :  { %461 = vmatprep.subr.bf16.mxu1 %v508_v3 }
  0x13   :  { %p491_p3 = por %p490_p2, %p489_p1 }
  0x14   :  { %442 = vmatpush3.bf16.msra.mxu0 %v441_v19 }
  0x15   :  { %443 = vmatprep.subr.bf16.mxu0 %v508_v3  ;;  %463 = vmatpush3.bf16.msra.mxu1 %v462_v38  ;;  %p492_p4 = pnand %p491_p3, %p485_p0 }
  0x16   :  { %464 = vmatprep.subr.bf16.mxu1 %v508_v3 }
  0x18   :  { %445 = vmatpush3.bf16.msra.mxu0 %v444_v22 }
  0x19   :  { %446 = vmatprep.subr.bf16.mxu0 %v508_v3 }
  0x1c   :  { %448 = vmatpush3.bf16.msra.mxu0 %v447_v25 }
  0x1d   :  { %449 = vmatprep.subr.bf16.mxu0 %v508_v3 }
  0x20   :  { %451 = vmatpush3.bf16.msra.mxu0 %v450_v28 }
  0x23   :  { %388 = vmatmul.mubr.f32.vlgmr.msra.gmra.mrb[0].mxu0 %v27_v29 }
  0xf6   :  { %v117_v40 = vpop.f32.mrb[0].mxu0 }
  0xf7   :  { %v118_v41 = vadd.f32 %v315_v39, %v117_v40  ;;  %v389_v42 = vpop.f32.mrb[1].mxu0 }
  0xf9   :  { %480 = vtanh.f32 %v118_v41 }
 0x103   :  { %v481_v46 = vpop.eup %480 }
 0x104   :  { %407 = vmatmul.mubr.msk.f32.vlgmr.msra.gmra.mrb[0].mxu1 %vm137_vm1, %v481_v46 }
 0x105   :  { %466 = vmatpush3.bf16.msra.mxu1 %v465_v45  ;;  %425 = vmatprep.mubr.msk.f32.mxu1 %vm509_vm0, %v510_v6 }
 0x106   :  { %467 = vmatprep.subr.bf16.mxu1 %v508_v3 }
 0x109   :  { %469 = vmatpush3.bf16.msra.mxu1 %v468_v49 }
 0x10a   :  { %470 = vmatprep.subr.bf16.mxu1 %v508_v3 }
 0x10d   :  { %472 = vmatpush3.bf16.msra.mxu1 %v471_v52 }
 0x10e   :  { %473 = vmatprep.subr.bf16.mxu1 %v508_v3 }
 0x111   :  { %475 = vmatpush3.bf16.msra.mxu1 %v474_v55 }
 0x1d7   :  { %v207_v57 = vpop.f32.mrb[0].mxu1 }
 0x1d8   :  { %v208_v58 = vadd.f32 %v316_v56, %v207_v57  ;;  %v408_v59 = vpop.f32.mrb[1].mxu1 }
 0x1da   :  { %482 = vtanh.f32 %v208_v58 }
 0x1e4   :  { %v483_v60 = vpop.eup %482 }
 0x1e5   :  { %426 = vmatmul.mubr.msk.f32.vlgmr.msra.gmra.mrb[2].mxu1 %vm137_vm1, %v483_v60 }
 0x2b8   :  { %v296_v62 = vpop.f32.mrb[2].mxu1 }
 0x2b9   :  { %v297_v63 = vadd.f32 %v318_v61, %v296_v62  ;;  %v427_v0 = vpop.f32.mrb[3].mxu1 }
 0x2bb   :  { %300 = vst [vmem:[#allocation2] sm:$0xff] %v297_v63 }
 0x2bc   :  { %495 = shalt.err (!%p492_p4)
}
 0x2bd   :  { %s496_s24 = scalar_lea.hbm %s703_s7, 128 }
 0x2be   :  { %p497_p5 = scmp.ne.s32.totalorder %s703_s7, %s496_s24  ;;  %p500_p6 = scmp.lt.u32.totalorder %s496_s24, %s703_s7 }
 0x2c0   :  { %p502_p7 = pnand %p500_p6, %p497_p5 }
 0x2c2   :  { %505 = shalt.err (!%p502_p7)
}
 0x2c3   :  { %310 = dma.vmem_to_hbm [thread:$0]  %s308_s22, 128, %s703_s7, [#allocation3]  }
 0x2c4   :  { %506 = dma.done.wait [#allocation3], 128  }
 0x2c5   :  { %507 = vsyncadd [#allocation3], 4294967168 }
 0x2c6   :  { %314 = vsyncpa [#allocation3], 1 }

</bundles_post_ra>
